<compile_context>
chip_gen: v6e
topology: v6e:2x2x1
jax: 0.10.0
libtpu: 0.0.40
codegen_flags: <defaults>
</compile_context>

<pallas_src>
import functools

import jax
import jax.numpy as jnp
import numpy as np
from jax.experimental import pallas as pl
from jax.experimental.pallas import tpu as pltpu


def _attention_kernel(*refs, add_topo, matmul_dtype, approx_recip):
    """One grid step = one batch element (full sequence, all heads).

    Weight refs arrive host-pre-transposed and pre-split per head:
        wq_ref : (H, D, hd)   (softmax scale already folded in)
        wk_ref : (H, D, hd)
        wv_ref : (H, D, hd)
        wp_ref : (H, hd, D)
        bp_ref : (1, D)
    so the kernel does only head-batched MXU contractions + elementwise ops.
    """
    if add_topo:
        x_ref, topo_ref, wq_ref, wk_ref, wv_ref, wp_ref, bp_ref, o_ref = refs
    else:
        x_ref, wq_ref, wk_ref, wv_ref, wp_ref, bp_ref, o_ref = refs

    x = x_ref[0]                                    # (N, D) fp32
    n, d = x.shape
    h = wq_ref.shape[0]

    # fp32 add (done outside autocast in the original), then cast for the MXU.
    xm = jnp.broadcast_to(x.astype(matmul_dtype), (h, n, d))            # (H, N, D)
    if add_topo:
        xkv = x + topo_ref[0]
        xkvm = jnp.broadcast_to(xkv.astype(matmul_dtype), (h, n, d))
    else:
        xkvm = xm

    # Head-batched projections on the MXU, fp32 accumulation. Scale folded into Wq.
    q = jnp.einsum('hnd,hdf->hnf', xm, wq_ref[...],
                   preferred_element_type=jnp.float32)                  # (H, N, hd)
    k = jnp.einsum('hnd,hdf->hnf', xkvm, wk_ref[...],
                   preferred_element_type=jnp.float32)                  # (H, N, hd)
    v = jnp.einsum('hnd,hdf->hnf', xkvm, wv_ref[...],
                   preferred_element_type=jnp.float32)                  # (H, N, hd)

    # Attention core in fp32 (matches the autocast(False) block of the module).
    logits = jnp.einsum('hqf,hkf->hqk', q, k,
                        preferred_element_type=jnp.float32)             # (H, N, N)
    logits = logits - jnp.max(logits, axis=-1, keepdims=True)
    p = jnp.exp(logits)
    denom = jnp.sum(p, axis=-1, keepdims=True)
    if approx_recip:
        p = p * pl.reciprocal(denom, approx=True)   # EUP slot, frees VALU
    else:
        p = p / denom                               # exact divide for the fp32 path

    ctx = jnp.einsum('hqk,hkf->hqf', p.astype(matmul_dtype), v.astype(matmul_dtype),
                     preferred_element_type=jnp.float32)                # (H, N, hd)

    # Output projection: per-head partials (H, N, D), summed over heads, plus bias.
    out_h = jnp.einsum('hqf,hfd->hqd', ctx.astype(matmul_dtype), wp_ref[...],
                       preferred_element_type=jnp.float32)              # (H, N, D)
    o_ref[0] = (jnp.sum(out_h, axis=0) + bp_ref[0]).astype(o_ref.dtype)


def attention_forward(x, topo_all_fea, block_pos, params, num_heads, *, precision="fp32"):
    """Pallas forward. x, topo_all_fea: (B, N, D) float32. precision: 'fp32'|'bf16'."""
    b, n, d = x.shape
    assert d % num_heads == 0, "embed_dim must be divisible by num_heads"
    assert x.shape == topo_all_fea.shape
    hd = d // num_heads
    scale = hd ** (-0.5)
    add_topo = (block_pos == 'end')
    matmul_dtype = jnp.bfloat16 if precision == "bf16" else jnp.float32

    wq = params["wq"]          # (D, D)
    wkv = params["wkv"]        # (2D, D)
    wp = params["wproj"]       # (D, D)
    bp = params["bproj"]       # (D,)

    # Host-side weight prep (done once, free relative to the kernel):
    #   transpose to (in, out), fold softmax scale into Wq, split kv, split heads.
    wq_h = (wq.T * scale).reshape(d, num_heads, hd).transpose(1, 0, 2)  # (H, D, hd)
    wk_h = wkv[:d].T.reshape(d, num_heads, hd).transpose(1, 0, 2)       # (H, D, hd)
    wv_h = wkv[d:].T.reshape(d, num_heads, hd).transpose(1, 0, 2)       # (H, D, hd)
    wp_h = wp.T.reshape(num_heads, hd, d)                               # (H, hd, D)
    wq_h = wq_h.astype(matmul_dtype)
    wk_h = wk_h.astype(matmul_dtype)
    wv_h = wv_h.astype(matmul_dtype)
    wp_h = wp_h.astype(matmul_dtype)
    bp2 = bp.reshape(1, d).astype(jnp.float32)

    kernel = functools.partial(_attention_kernel,
                               add_topo=add_topo,
                               matmul_dtype=matmul_dtype,
                               approx_recip=(precision == "bf16"))

    in_specs = [pl.BlockSpec((1, n, d), lambda i: (i, 0, 0))]            # x
    args = [x]
    if add_topo:  # only stream topo_all_fea from HBM when it is actually used
        in_specs.append(pl.BlockSpec((1, n, d), lambda i: (i, 0, 0)))    # topo
        args.append(topo_all_fea)
    in_specs += [
        pl.BlockSpec((num_heads, d, hd), lambda i: (0, 0, 0)),           # Wq (scaled)
        pl.BlockSpec((num_heads, d, hd), lambda i: (0, 0, 0)),           # Wk
        pl.BlockSpec((num_heads, d, hd), lambda i: (0, 0, 0)),           # Wv
        pl.BlockSpec((num_heads, hd, d), lambda i: (0, 0, 0)),           # Wproj
        pl.BlockSpec((1, d), lambda i: (0, 0)),                          # bproj
    ]
    args += [wq_h, wk_h, wv_h, wp_h, bp2]

    grid_spec = pltpu.PrefetchScalarGridSpec(
        num_scalar_prefetch=0,
        grid=(b,),
        in_specs=in_specs,
        out_specs=pl.BlockSpec((1, n, d), lambda i: (i, 0, 0)),
    )

    return pl.pallas_call(
        kernel,
        out_shape=jax.ShapeDtypeStruct((b, n, d), jnp.float32),
        grid_spec=grid_spec,
        compiler_params=pltpu.CompilerParams(
            dimension_semantics=("parallel",),
            vmem_limit_bytes=64 * 1024 * 1024,
        ),
    )(*args)


def attention_reference(x, topo_all_fea, block_pos, params, num_heads):
    """Pure-JAX reference mirroring the PyTorch forward exactly (fp32)."""
    b, n, d = x.shape
    hd = d // num_heads
    scale = hd ** (-0.5)
    xkv = x + topo_all_fea if block_pos == 'end' else x

    kv = xkv @ params["wkv"].T                                        # (B, N, 2D)
    q = x @ params["wq"].T                                            # (B, N, D)

    kv = kv.reshape(b, n, 2, num_heads, hd).transpose(2, 0, 3, 1, 4)  # (2, B, H, N, hd)
    q = q.reshape(b, n, 1, num_heads, hd).transpose(2, 0, 3, 1, 4)[0] # (B, H, N, hd)
    k, v = kv[0], kv[1]

    attn = jnp.einsum("bhqd,bhkd->bhqk", q, k) * scale
    attn = jax.nn.softmax(attn, axis=-1)
    out = jnp.einsum("bhqk,bhkd->bhqd", attn, v)                      # (B, H, N, hd)
    out = out.transpose(0, 2, 1, 3).reshape(b, n, d)
    return out @ params["wproj"].T + params["bproj"]


def init_params(key, dim, num_heads):
    """Deterministic synthetic parameters (PyTorch-default-like uniform init)."""
    k1, k2, k3, k4 = jax.random.split(key, 4)
    bound = 1.0 / np.sqrt(dim)
    return {
        # qkv_bias=False in the module default -> no bias on kv / q_.
        "wkv": jax.random.uniform(k1, (2 * dim, dim), jnp.float32, -bound, bound),
        "wq": jax.random.uniform(k2, (dim, dim), jnp.float32, -bound, bound),
        "wproj": jax.random.uniform(k3, (dim, dim), jnp.float32, -bound, bound),
        "bproj": jax.random.uniform(k4, (dim,), jnp.float32, -bound, bound),
    }


if __name__ == "__main__":
    B, N, D = 2, 8, 32
    NUM_HEADS = 4  # head_dim = 8

    key = jax.random.PRNGKey(0)
    kx, kt, kp = jax.random.split(key, 3)
    x = jax.random.normal(kx, (B, N, D), jnp.float32)
    topo = jax.random.normal(kt, (B, N, D), jnp.float32)
    params = init_params(kp, D, NUM_HEADS)

    for block_pos in ("mid", "end"):
        ref = attention_reference(x, topo, block_pos, params, NUM_HEADS)

        # fp32 path: bit-close to the reference.
        out = attention_forward(x, topo, block_pos, params, NUM_HEADS, precision="fp32")
        out = jax.block_until_ready(out)
        np.testing.assert_allclose(np.asarray(out), np.asarray(ref),
                                   rtol=1e-5, atol=1e-5)

        # bf16 fast path (fp32 accumulation): looser tolerance, as per review.
        out_fast = attention_forward(x, topo, block_pos, params, NUM_HEADS,
                                     precision="bf16")
        out_fast = jax.block_until_ready(out_fast)
        np.testing.assert_allclose(np.asarray(out_fast), np.asarray(ref),
                                   rtol=5e-2, atol=5e-2)

    print("KERNEL_OK")
</pallas_src>

<mosaic_0001>
module attributes {stable_mosaic.version = 11 : i64} {
  func.func @_attention_kernel(%arg0: i32, %arg1: memref<1x8x32xf32, #tpu.memory_space<vmem>>, %arg2: memref<4x32x8xf32, #tpu.memory_space<vmem>>, %arg3: memref<4x32x8xf32, #tpu.memory_space<vmem>>, %arg4: memref<4x32x8xf32, #tpu.memory_space<vmem>>, %arg5: memref<4x8x32xf32, #tpu.memory_space<vmem>>, %arg6: memref<1x32xf32, #tpu.memory_space<vmem>>, %arg7: memref<1x8x32xf32, #tpu.memory_space<vmem>>) attributes {dimension_semantics = [#tpu.dimension_semantics<parallel>], iteration_bounds = array<i64: 2>, scalar_prefetch = 0 : i64, scratch_operands = 0 : i64, tpu.core_type = #tpu.core_type<tc>, window_params = [{transform_indices = @transform_0, window_bounds = array<i64: 1, 8, 32>}, {pipeline_mode = #tpu.pipeline_mode<synchronous>, transform_indices = @transform_1, window_bounds = array<i64: 4, 32, 8>}, {pipeline_mode = #tpu.pipeline_mode<synchronous>, transform_indices = @transform_2, window_bounds = array<i64: 4, 32, 8>}, {pipeline_mode = #tpu.pipeline_mode<synchronous>, transform_indices = @transform_3, window_bounds = array<i64: 4, 32, 8>}, {pipeline_mode = #tpu.pipeline_mode<synchronous>, transform_indices = @transform_4, window_bounds = array<i64: 4, 8, 32>}, {pipeline_mode = #tpu.pipeline_mode<synchronous>, transform_indices = @transform_5, window_bounds = array<i64: 1, 32>}, {transform_indices = @transform_6, window_bounds = array<i64: 1, 8, 32>}]} {
    %c0 = arith.constant 0 : index
    %c0_0 = arith.constant 0 : index
    %c0_1 = arith.constant 0 : index
    %0 = vector.load %arg1[%c0, %c0_0, %c0_1] : memref<1x8x32xf32, #tpu.memory_space<vmem>>, vector<1x8x32xf32>
    %1 = vector.shape_cast %0 : vector<1x8x32xf32> to vector<8x32xf32>
    %2 = vector.shape_cast %1 : vector<8x32xf32> to vector<1x8x32xf32>
    %3 = vector.broadcast %2 : vector<1x8x32xf32> to vector<4x8x32xf32>
    %c0_2 = arith.constant 0 : index
    %c0_3 = arith.constant 0 : index
    %c0_4 = arith.constant 0 : index
    %4 = vector.load %arg2[%c0_2, %c0_3, %c0_4] : memref<4x32x8xf32, #tpu.memory_space<vmem>>, vector<4x32x8xf32>
    "tpu.trace_start"() <{level = 10 : i32, message = "hnd,hdf->hnf"}> : () -> ()
    %cst = arith.constant dense<0.000000e+00> : vector<4x8x8xf32>
    %5 = tpu.matmul %3, %4, %cst {dimension_numbers = #tpu.dot_dimension_numbers<[2], [1], [1], [2], [0, 0, 0, 1, 1, 2], [0], [0]>} : vector<4x8x32xf32>, vector<4x32x8xf32>, vector<4x8x8xf32> -> vector<4x8x8xf32>
    "tpu.trace_stop"() : () -> ()
    %c0_5 = arith.constant 0 : index
    %c0_6 = arith.constant 0 : index
    %c0_7 = arith.constant 0 : index
    %6 = vector.load %arg3[%c0_5, %c0_6, %c0_7] : memref<4x32x8xf32, #tpu.memory_space<vmem>>, vector<4x32x8xf32>
    "tpu.trace_start"() <{level = 10 : i32, message = "hnd,hdf->hnf"}> : () -> ()
    %cst_8 = arith.constant dense<0.000000e+00> : vector<4x8x8xf32>
    %7 = tpu.matmul %3, %6, %cst_8 {dimension_numbers = #tpu.dot_dimension_numbers<[2], [1], [1], [2], [0, 0, 0, 1, 1, 2], [0], [0]>} : vector<4x8x32xf32>, vector<4x32x8xf32>, vector<4x8x8xf32> -> vector<4x8x8xf32>
    "tpu.trace_stop"() : () -> ()
    %c0_9 = arith.constant 0 : index
    %c0_10 = arith.constant 0 : index
    %c0_11 = arith.constant 0 : index
    %8 = vector.load %arg4[%c0_9, %c0_10, %c0_11] : memref<4x32x8xf32, #tpu.memory_space<vmem>>, vector<4x32x8xf32>
    "tpu.trace_start"() <{level = 10 : i32, message = "hnd,hdf->hnf"}> : () -> ()
    %cst_12 = arith.constant dense<0.000000e+00> : vector<4x8x8xf32>
    %9 = tpu.matmul %3, %8, %cst_12 {dimension_numbers = #tpu.dot_dimension_numbers<[2], [1], [1], [2], [0, 0, 0, 1, 1, 2], [0], [0]>} : vector<4x8x32xf32>, vector<4x32x8xf32>, vector<4x8x8xf32> -> vector<4x8x8xf32>
    "tpu.trace_stop"() : () -> ()
    "tpu.trace_start"() <{level = 10 : i32, message = "hqf,hkf->hqk"}> : () -> ()
    %cst_13 = arith.constant dense<0.000000e+00> : vector<4x8x8xf32>
    %10 = tpu.matmul %5, %7, %cst_13 {dimension_numbers = #tpu.dot_dimension_numbers<[2], [2], [1], [1], [0, 0, 0, 1, 1, 1], [0], [0]>} : vector<4x8x8xf32>, vector<4x8x8xf32>, vector<4x8x8xf32> -> vector<4x8x8xf32>
    "tpu.trace_stop"() : () -> ()
    %cst_14 = arith.constant dense<0xFF800000> : vector<4x8xf32>
    %11 = vector.multi_reduction <maximumf>, %10, %cst_14 [2] : vector<4x8x8xf32> to vector<4x8xf32>
    %12 = vector.shape_cast %11 : vector<4x8xf32> to vector<4x8x1xf32>
    %13 = vector.broadcast %12 : vector<4x8x1xf32> to vector<4x8x8xf32>
    %14 = arith.subf %10, %13 : vector<4x8x8xf32>
    %15 = math.exp %14 : vector<4x8x8xf32>
    %cst_15 = arith.constant dense<0.000000e+00> : vector<4x8xf32>
    %16 = vector.multi_reduction <add>, %15, %cst_15 [2] : vector<4x8x8xf32> to vector<4x8xf32>
    %17 = vector.shape_cast %16 : vector<4x8xf32> to vector<4x8x1xf32>
    %18 = vector.broadcast %17 : vector<4x8x1xf32> to vector<4x8x8xf32>
    %19 = arith.divf %15, %18 : vector<4x8x8xf32>
    "tpu.trace_start"() <{level = 10 : i32, message = "hqk,hkf->hqf"}> : () -> ()
    %cst_16 = arith.constant dense<0.000000e+00> : vector<4x8x8xf32>
    %20 = tpu.matmul %19, %9, %cst_16 {dimension_numbers = #tpu.dot_dimension_numbers<[2], [1], [1], [2], [0, 0, 0, 1, 1, 2], [0], [0]>} : vector<4x8x8xf32>, vector<4x8x8xf32>, vector<4x8x8xf32> -> vector<4x8x8xf32>
    "tpu.trace_stop"() : () -> ()
    %c0_17 = arith.constant 0 : index
    %c0_18 = arith.constant 0 : index
    %c0_19 = arith.constant 0 : index
    %21 = vector.load %arg5[%c0_17, %c0_18, %c0_19] : memref<4x8x32xf32, #tpu.memory_space<vmem>>, vector<4x8x32xf32>
    "tpu.trace_start"() <{level = 10 : i32, message = "hqf,hfd->hqd"}> : () -> ()
    %cst_20 = arith.constant dense<0.000000e+00> : vector<4x8x32xf32>
    %22 = tpu.matmul %20, %21, %cst_20 {dimension_numbers = #tpu.dot_dimension_numbers<[2], [1], [1], [2], [0, 0, 0, 1, 1, 2], [0], [0]>} : vector<4x8x8xf32>, vector<4x8x32xf32>, vector<4x8x32xf32> -> vector<4x8x32xf32>
    "tpu.trace_stop"() : () -> ()
    %cst_21 = arith.constant dense<0.000000e+00> : vector<8x32xf32>
    %23 = vector.multi_reduction <add>, %22, %cst_21 [0] : vector<4x8x32xf32> to vector<8x32xf32>
    %c0_22 = arith.constant 0 : index
    %c0_23 = arith.constant 0 : index
    %24 = vector.load %arg6[%c0_22, %c0_23] : memref<1x32xf32, #tpu.memory_space<vmem>>, vector<1x32xf32>
    %25 = vector.shape_cast %24 : vector<1x32xf32> to vector<32xf32>
    %26 = vector.shape_cast %25 : vector<32xf32> to vector<1x32xf32>
    %27 = vector.broadcast %26 : vector<1x32xf32> to vector<8x32xf32>
    %28 = arith.addf %23, %27 : vector<8x32xf32>
    %c0_24 = arith.constant 0 : index
    %c0_25 = arith.constant 0 : index
    %c0_26 = arith.constant 0 : index
    %29 = vector.load %arg7[%c0_24, %c0_25, %c0_26] : memref<1x8x32xf32, #tpu.memory_space<vmem>>, vector<1x8x32xf32>
    %30 = vector.shape_cast %29 : vector<1x8x32xf32> to vector<8x32xf32>
    %31 = vector.shape_cast %28 : vector<8x32xf32> to vector<1x8x32xf32>
    tpu.vector_store %arg7[%c0_24, %c0_25, %c0_26], %31 {strides = array<i32>} : memref<1x8x32xf32, #tpu.memory_space<vmem>>, vector<1x8x32xf32>,
    return
  }
  func.func @transform_0(%arg0: i32) -> (i32, i32, i32) {
    %c0_i32 = arith.constant 0 : i32
    %c0_i32_0 = arith.constant 0 : i32
    %c0_i32_1 = arith.constant 0 : i32
    return %arg0, %c0_i32, %c0_i32_0 : i32, i32, i32
  }
  func.func @transform_1(%arg0: i32) -> (i32, i32, i32) {
    %c0_i32 = arith.constant 0 : i32
    %c0_i32_0 = arith.constant 0 : i32
    %c0_i32_1 = arith.constant 0 : i32
    %c0_i32_2 = arith.constant 0 : i32
    return %c0_i32, %c0_i32_0, %c0_i32_1 : i32, i32, i32
  }
  func.func @transform_2(%arg0: i32) -> (i32, i32, i32) {
    %c0_i32 = arith.constant 0 : i32
    %c0_i32_0 = arith.constant 0 : i32
    %c0_i32_1 = arith.constant 0 : i32
    %c0_i32_2 = arith.constant 0 : i32
    return %c0_i32, %c0_i32_0, %c0_i32_1 : i32, i32, i32
  }
  func.func @transform_3(%arg0: i32) -> (i32, i32, i32) {
    %c0_i32 = arith.constant 0 : i32
    %c0_i32_0 = arith.constant 0 : i32
    %c0_i32_1 = arith.constant 0 : i32
    %c0_i32_2 = arith.constant 0 : i32
    return %c0_i32, %c0_i32_0, %c0_i32_1 : i32, i32, i32
  }
  func.func @transform_4(%arg0: i32) -> (i32, i32, i32) {
    %c0_i32 = arith.constant 0 : i32
    %c0_i32_0 = arith.constant 0 : i32
    %c0_i32_1 = arith.constant 0 : i32
    %c0_i32_2 = arith.constant 0 : i32
    return %c0_i32, %c0_i32_0, %c0_i32_1 : i32, i32, i32
  }
  func.func @transform_5(%arg0: i32) -> (i32, i32) {
    %c0_i32 = arith.constant 0 : i32
    %c0_i32_0 = arith.constant 0 : i32
    %c0_i32_1 = arith.constant 0 : i32
    return %c0_i32, %c0_i32_0 : i32, i32
  }
  func.func @transform_6(%arg0: i32) -> (i32, i32, i32) {
    %c0_i32 = arith.constant 0 : i32
    %c0_i32_0 = arith.constant 0 : i32
    %c0_i32_1 = arith.constant 0 : i32
    return %arg0, %c0_i32, %c0_i32_0 : i32, i32, i32
  }
}

</mosaic_0001>

<bundles_post_ra>
// kernel: tpu_custom_call.1
= control target key start
LH: loop header
LB: loop body
LE: loop exit
PB: predicated region body
PF: predicated region fallthrough
CT: control target
= control target key end

     0   :  { %11 = vsyncpa [#allocation3], 0  ;;  %s3050_s0 = inlined_call_operand.vmem [shape: f32[2,8,32], index: 0, kind: input, shape index: {}]   ;;  %s3051_s1 = inlined_call_operand.vmem [shape: f32[4,32,8], index: 1, kind: input, shape index: {}]   ;;  %s3052_s2 = inlined_call_operand.vmem [shape: f32[4,32,8], index: 2, kind: input, shape index: {}]   ;;  %s3053_s3 = inlined_call_operand.vmem [shape: f32[4,32,8], index: 3, kind: input, shape index: {}]   ;;  %s3054_s4 = inlined_call_operand.vmem [shape: f32[4,8,32], index: 4, kind: input, shape index: {}]   ;;  %s3055_s5 = inlined_call_operand.vmem [shape: f32[1,32], index: 5, kind: input, shape index: {}]   ;;  %s3056_s6 = inlined_call_operand.hbm [shape: f32[2,8,32], index: 6, kind: output, shape index: {}]  }
   0x1   :  { %13 = vsyncpa [#allocation3 + $0x1], 0  ;;  %s2638_s21 = smov 0   ;;  %s2640_s22 = smov 0  }
   0x2   :  { %s2642_s23 = smov 0   ;;  %s2644_s24 = smov 0  }
   0x3 LB: > { %s2659_s25 = sadd.s32 4294967295, %s2598_s24   ;;  %s2166_s26 = sadd.s32 4294967294, %s2598_s24   ;;  %s2598_s24 = sphi %s2644_s24, %s3062_s24   ;;  %s2594_s23 = sphi %s2642_s23, %s3061_s23   ;;  %s2590_s22 = sphi %s2640_s22, %s3060_s22   ;;  %s2586_s21 = sphi %s2638_s21, %s3059_s21  }
   0x4   : > { %s2663_s27 = sadd.s32 1, %s2598_s24   ;;  %s157_s28 = sadd.s32 1, %s2594_s23 }
   0x5   : > { %s154_s29 = ssub.s32 %s2598_s24, %s2663_s27  ;;  %p167_p0 = scmp.ne.s32.totalorder %s2594_s23, %s2590_s22 }
   0x6   : > { %p155_p1 = scmp.eq.s32.totalorder %s154_s29, 0  ;;  %p168_p2 = scmp.eq.s32.totalorder %s2659_s25, 1 }
   0x7   : > { %p173_p3 = scmp.ne.s32.totalorder %s2590_s22, %s2586_s21  ;;  %p174_p4 = scmp.eq.s32.totalorder %s2166_s26, 1 }
   0x8   : > { %s2674_s30 = scalar_select %p155_p1, %s2594_s23, %s157_s28  }
   0x9   : > { %p2676_p5 = por %p168_p2, %p167_p0  ;;  %p2680_p6 = por %p174_p4, %p173_p3 }
   0xa   : > { %p2169_p7 = scmp.ge.s32.totalorder %s2598_s24, 1  ;;  %p214_p8 = scmp.lt.s32.totalorder %s2598_s24, 3 }
   0xc   : > { %p215_p9 = pnand %p2169_p7, %p214_p8 }
   0xd   : > { %p243_p10 = scmp.lt.s32.totalorder (!%p215_p9), %s2659_s25, 1  ;;  %s240_s13 = sand.u32 (!%p215_p9), 1, %s2590_s22  }
   0xe   : > { %218 = sbr.rel (%p215_p9) target bundleno = 1168 (0x490), region = 44  ;;  %s2170_s14 = sshll.u32 (!%p215_p9), %s240_s13, 3 }
   0xf   : > { %s242_s18 = scalar_lea.vmem (!%p215_p9), [#allocation2], %s2170_s14  ;;  %s2094_s29 = scalar_lea.sflag (!%p215_p9), [#allocation3], %s240_s13 }
  0x10   : > { %s2107_s19 = sshll.u32 (!%p215_p9), %s242_s18, 4  ;;  %s2602_s10 = smov (!%p215_p9), [#allocation2]   ;;  %s2108_s19 = int_to_ptr.vmem [resolvable:$true] %s2107_s19 }
  0x11   : > { %s2538_s9 = scalar_lea.vmem (!%p215_p9), %s2108_s19, 128 }
  0x12   : > { %p2539_p11 = scmp.ne.s32.totalorder (!%p215_p9), %s2108_s19, %s2538_s9 }
  0x13   : > { %v251_v0 = vld [vmem:[%s3051_s1 + $0x18] sm:$0xff]  ;;  %v2600_v2 = vmov 0.0   ;;  %v250_v3 = vld [vmem:[%s3051_s1 + $0x10] sm:$0xff]  ;;  %s244_s17 = scalar_select %p243_p10, %s2659_s25, 1  ;;  %v249_v5 = vld [vmem:[%s3051_s1 + $0x8] sm:$0xff]  ;;  %vm264_vm0 = vcmask 261120  }
  0x14   : > { %v255_v1 = vld [vmem:[%s3051_s1 + $0x38] sm:$0xff]  ;;  %2289 = vmatprep.subr.mxu0 %v2600_v2  ;;  %2300 = vmatprep.subr.mxu1 %v2600_v2  ;;  %v254_v4 = vld [vmem:[%s3051_s1 + $0x30] sm:$0xff]  ;;  %v253_v6 = vld [vmem:[%s3051_s1 + $0x28] sm:$0xff]  ;;  %vm2601_vm1 = vmmov 0   ;;  %vm1140_vm2 = vcmask 64512   ;;  %p2540_p12 = pnand %p2539_p11, %p2676_p5 }
  0x15   : > { %2290 = vmatpush3.msra.mxu0 %v251_v0  ;;  %2301 = vmatpush3.msra.mxu1 %v255_v1  ;;  %s2171_s28 = sshll.u32 %s244_s17, 3  ;;  %v248_v7 = vld [vmem:[%s3051_s1] sm:$0xff]  ;;  %v259_v10 = vld [vmem:[%s3051_s1 + $0x58] sm:$0xff]  ;;  %v258_v12 = vld [vmem:[%s3051_s1 + $0x50] sm:$0xff]  ;;  %s2202_s17 = sshll.u32 %s2659_s25, 7 }
  0x16   : > { %2291 = vmatprep.subr.mxu0 %v2600_v2  ;;  %2302 = vmatprep.subr.mxu1 %v2600_v2  ;;  %s246_s12 = scalar_lea.vmem %s3050_s0, %s2171_s28  ;;  %v252_v8 = vld [vmem:[%s3051_s1 + $0x20] sm:$0xff]  ;;  %v263_v11 = vld [vmem:[%s3051_s1 + $0x78] sm:$0xff]  ;;  %v262_v13 = vld [vmem:[%s3051_s1 + $0x70] sm:$0xff]  ;;  %s2105_s28 = scalar_lea.hbm %s3056_s6, %s2202_s17 }
  0x17   : > { %2292 = vmatpush3.msra.mxu0 %v250_v3  ;;  %2303 = vmatpush3.msra.mxu1 %v254_v4  ;;  %v2721_v9 = vld [vmem:[%s246_s12] sm:$0xff]  ;;  %v257_v14 = vld [vmem:[%s3051_s1 + $0x48] sm:$0xff]  ;;  %v551_v18 = vld [vmem:[%s3052_s2 + $0x18] sm:$0xff]  ;;  %p2541_p13 = pneg %p2540_p12  ;;  %s2542_s25 = sshll.u32 %s2602_s10, 4  ;;  %s2543_s25 = int_to_ptr.vmem [resolvable:$false] %s2542_s25 }
  0x18   : > { %2293 = vmatprep.subr.mxu0 %v2600_v2  ;;  %2304 = vmatprep.subr.mxu1 %v2600_v2  ;;  %v261_v15 = vld [vmem:[%s3051_s1 + $0x68] sm:$0xff]  ;;  %v256_v16 = vld [vmem:[%s3051_s1 + $0x40] sm:$0xff]  ;;  %v555_v19 = vld [vmem:[%s3052_s2 + $0x38] sm:$0xff]  ;;  %s2544_s11 = scalar_lea.vmem %s2543_s25, 256  ;;  %p2545_p0 = scmp.lt.s32.totalorder %s2108_s19, %s2543_s25 }
  0x19   : > { %2294 = vmatpush3.msra.mxu0 %v249_v5  ;;  %2305 = vmatpush3.msra.mxu1 %v253_v6  ;;  %v260_v17 = vld [vmem:[%s3051_s1 + $0x60] sm:$0xff]  ;;  %v550_v20 = vld [vmem:[%s3052_s2 + $0x10] sm:$0xff]  ;;  %v549_v22 = vld [vmem:[%s3052_s2 + $0x8] sm:$0xff]  ;;  %p2546_p1 = scmp.lt.s32.totalorder %s2544_s11, %s2538_s9 }
  0x1a   : > { %2295 = vmatprep.subr.mxu0 %v2600_v2  ;;  %2306 = vmatprep.subr.mxu1 %v2600_v2  ;;  %v554_v21 = vld [vmem:[%s3052_s2 + $0x30] sm:$0xff]  ;;  %v553_v23 = vld [vmem:[%s3052_s2 + $0x28] sm:$0xff]  ;;  %v548_v24 = vld [vmem:[%s3052_s2] sm:$0xff] }
  0x1b   : > { %2296 = vmatpush3.msra.mxu0 %v248_v7  ;;  %2297 = vmatprep.mubr.msk.f32.mxu0 %vm2601_vm1, %v2600_v2  ;;  %v552_v25 = vld [vmem:[%s3052_s2 + $0x20] sm:$0xff]  ;;  %v559_v26 = vld [vmem:[%s3052_s2 + $0x58] sm:$0xff]  ;;  %v558_v28 = vld [vmem:[%s3052_s2 + $0x50] sm:$0xff]  ;;  %p2547_p2 = por %p2546_p1, %p2545_p0 }
  0x1c   : > { %2307 = vmatpush3.msra.mxu1 %v252_v8  ;;  %2298 = vmatmul.mubr.msk.f32.vlgmr.msra.gmra.mxu0 %vm264_vm0, %v2721_v9  ;;  %v563_v27 = vld [vmem:[%s3052_s2 + $0x78] sm:$0xff]  ;;  %v562_v29 = vld [vmem:[%s3052_s2 + $0x70] sm:$0xff]  ;;  %v557_v30 = vld [vmem:[%s3052_s2 + $0x48] sm:$0xff] }
  0x1d   : > { %2308 = vmatprep.mubr.msk.f32.mxu1 %vm2601_vm1, %v2600_v2  ;;  %2311 = vmatprep.subr.mxu0 %v2600_v2  ;;  %v561_v31 = vld [vmem:[%s3052_s2 + $0x68] sm:$0xff]  ;;  %v556_v32 = vld [vmem:[%s3052_s2 + $0x40] sm:$0xff]  ;;  %v847_v34 = vld [vmem:[%s3053_s3 + $0x18] sm:$0xff]  ;;  %p2548_p3 = pnand %p2547_p2, %p2541_p13 }
  0x1e   : > { %2322 = vmatprep.subr.mxu1 %v2600_v2  ;;  %2309 = vmatmul.mubr.msk.f32.vlgmr.msra.gmra.mxu1 %vm264_vm0, %v2721_v9  ;;  %v560_v33 = vld [vmem:[%s3052_s2 + $0x60] sm:$0xff]  ;;  %v851_v35 = vld [vmem:[%s3053_s3 + $0x38] sm:$0xff]  ;;  %v846_v36 = vld [vmem:[%s3053_s3 + $0x10] sm:$0xff] }
  0x1f   : > { %2312 = vmatpush3.msra.mxu0 %v259_v10  ;;  %2323 = vmatpush3.msra.mxu1 %v263_v11  ;;  %v850_v37 = vld [vmem:[%s3053_s3 + $0x30] sm:$0xff]  ;;  %v845_v38 = vld [vmem:[%s3053_s3 + $0x8] sm:$0xff]  ;;  %v844_v40 = vld [vmem:[%s3053_s3] sm:$0xff] }
  0x20   : > { %2313 = vmatprep.subr.mxu0 %v2600_v2  ;;  %2324 = vmatprep.subr.mxu1 %v2600_v2  ;;  %v849_v39 = vld [vmem:[%s3053_s3 + $0x28] sm:$0xff]  ;;  %v848_v41 = vld [vmem:[%s3053_s3 + $0x20] sm:$0xff]  ;;  %v855_v42 = vld [vmem:[%s3053_s3 + $0x58] sm:$0xff] }
  0x21   : > { %2314 = vmatpush3.msra.mxu0 %v258_v12  ;;  %2325 = vmatpush3.msra.mxu1 %v262_v13  ;;  %v859_v43 = vld [vmem:[%s3053_s3 + $0x78] sm:$0xff]  ;;  %v854_v44 = vld [vmem:[%s3053_s3 + $0x50] sm:$0xff]  ;;  %v853_v46 = vld [vmem:[%s3053_s3 + $0x48] sm:$0xff] }
  0x22   : > { %2315 = vmatprep.subr.mxu0 %v2600_v2  ;;  %2326 = vmatprep.subr.mxu1 %v2600_v2  ;;  %v858_v45 = vld [vmem:[%s3053_s3 + $0x70] sm:$0xff]  ;;  %v857_v47 = vld [vmem:[%s3053_s3 + $0x68] sm:$0xff]  ;;  %v852_v48 = vld [vmem:[%s3053_s3 + $0x40] sm:$0xff] }
  0x23   : > { %2316 = vmatpush3.msra.mxu0 %v257_v14  ;;  %2327 = vmatpush3.msra.mxu1 %v261_v15  ;;  %v856_v49 = vld [vmem:[%s3053_s3 + $0x60] sm:$0xff] }
  0x24   : > { %2317 = vmatprep.subr.mxu0 %v2600_v2  ;;  %2328 = vmatprep.subr.mxu1 %v2600_v2 }
  0x25   : > { %2318 = vmatpush3.msra.mxu0 %v256_v16  ;;  %2319 = vmatprep.mubr.msk.f32.mxu0 %vm2601_vm1, %v2600_v2 }
  0x26   : > { %2329 = vmatpush3.msra.mxu1 %v260_v17  ;;  %2320 = vmatmul.mubr.msk.f32.vlgmr.msra.gmra.mxu0 %vm264_vm0, %v2721_v9 }
  0x27   : > { %2330 = vmatprep.mubr.msk.f32.mxu1 %vm2601_vm1, %v2600_v2  ;;  %2333 = vmatprep.subr.mxu0 %v2600_v2 }
  0x28   : > { %2344 = vmatprep.subr.mxu1 %v2600_v2  ;;  %2331 = vmatmul.mubr.msk.f32.vlgmr.msra.gmra.mxu1 %vm264_vm0, %v2721_v9 }
  0x29   : > { %2334 = vmatpush3.msra.mxu0 %v551_v18  ;;  %2345 = vmatpush3.msra.mxu1 %v555_v19 }
  0x2a   : > { %2335 = vmatprep.subr.mxu0 %v2600_v2  ;;  %2346 = vmatprep.subr.mxu1 %v2600_v2 }
  0x2b   : > { %2336 = vmatpush3.msra.mxu0 %v550_v20  ;;  %2347 = vmatpush3.msra.mxu1 %v554_v21 }
  0x2c   : > { %2337 = vmatprep.subr.mxu0 %v2600_v2  ;;  %2348 = vmatprep.subr.mxu1 %v2600_v2 }
  0x2d   : > { %2338 = vmatpush3.msra.mxu0 %v549_v22  ;;  %2349 = vmatpush3.msra.mxu1 %v553_v23 }
  0x2e   : > { %2339 = vmatprep.subr.mxu0 %v2600_v2  ;;  %2350 = vmatprep.subr.mxu1 %v2600_v2 }
  0x2f   : > { %2340 = vmatpush3.msra.mxu0 %v548_v24  ;;  %2341 = vmatprep.mubr.msk.f32.mxu0 %vm2601_vm1, %v2600_v2 }
  0x30   : > { %2351 = vmatpush3.msra.mxu1 %v552_v25  ;;  %2352 = vmatprep.mubr.msk.f32.mxu1 %vm2601_vm1, %v2600_v2 }
  0x31   : > { %2342 = vmatmul.mubr.msk.f32.vlgmr.msra.gmra.mxu0 %vm264_vm0, %v2721_v9  ;;  %2353 = vmatmul.mubr.msk.f32.vlgmr.msra.gmra.mxu1 %vm264_vm0, %v2721_v9 }
  0x32   : > { %2355 = vmatprep.subr.mxu0 %v2600_v2  ;;  %2366 = vmatprep.subr.mxu1 %v2600_v2 }
  0x33   : > { %2356 = vmatpush3.msra.mxu0 %v559_v26  ;;  %2367 = vmatpush3.msra.mxu1 %v563_v27 }
  0x34   : > { %2357 = vmatprep.subr.mxu0 %v2600_v2  ;;  %2368 = vmatprep.subr.mxu1 %v2600_v2 }
  0x35   : > { %2358 = vmatpush3.msra.mxu0 %v558_v28  ;;  %2369 = vmatpush3.msra.mxu1 %v562_v29 }
  0x36   : > { %2359 = vmatprep.subr.mxu0 %v2600_v2  ;;  %2370 = vmatprep.subr.mxu1 %v2600_v2 }
  0x37   : > { %2360 = vmatpush3.msra.mxu0 %v557_v30  ;;  %2371 = vmatpush3.msra.mxu1 %v561_v31 }
  0x38   : > { %2361 = vmatprep.subr.mxu0 %v2600_v2  ;;  %2372 = vmatprep.subr.mxu1 %v2600_v2 }
  0x39   : > { %2362 = vmatpush3.msra.mxu0 %v556_v32  ;;  %2363 = vmatprep.mubr.msk.f32.mxu0 %vm2601_vm1, %v2600_v2 }
  0x3a   : > { %2373 = vmatpush3.msra.mxu1 %v560_v33  ;;  %2374 = vmatprep.mubr.msk.f32.mxu1 %vm2601_vm1, %v2600_v2 }
  0x3b   : > { %2364 = vmatmul.mubr.msk.f32.vlgmr.msra.gmra.mxu0 %vm264_vm0, %v2721_v9  ;;  %2375 = vmatmul.mubr.msk.f32.vlgmr.msra.gmra.mxu1 %vm264_vm0, %v2721_v9 }
  0x3c   : > { %2377 = vmatprep.subr.mxu0 %v2600_v2  ;;  %2388 = vmatprep.subr.mxu1 %v2600_v2 }
  0x3d   : > { %2385 = vmatprep.mubr.msk.f32.mxu0 %vm2601_vm1, %v2600_v2  ;;  %2396 = vmatprep.mubr.msk.f32.mxu1 %vm2601_vm1, %v2600_v2 }
  0x3e   : > { %2378 = vmatpush3.msra.mxu0 %v847_v34  ;;  %2389 = vmatpush3.msra.mxu1 %v851_v35 }
  0x3f   : > { %2379 = vmatprep.subr.mxu0 %v2600_v2  ;;  %2390 = vmatprep.subr.mxu1 %v2600_v2 }
  0x40   : > { %2380 = vmatpush3.msra.mxu0 %v846_v36  ;;  %2391 = vmatpush3.msra.mxu1 %v850_v37 }
  0x41   : > { %2381 = vmatprep.subr.mxu0 %v2600_v2  ;;  %2392 = vmatprep.subr.mxu1 %v2600_v2 }
  0x42   : > { %2382 = vmatpush3.msra.mxu0 %v845_v38  ;;  %2393 = vmatpush3.msra.mxu1 %v849_v39 }
  0x43   : > { %2383 = vmatprep.subr.mxu0 %v2600_v2  ;;  %2394 = vmatprep.subr.mxu1 %v2600_v2 }
  0x44   : > { %2384 = vmatpush3.msra.mxu0 %v844_v40  ;;  %2395 = vmatpush3.msra.mxu1 %v848_v41 }
  0x45   : > { %2399 = vmatprep.subr.mxu0 %v2600_v2  ;;  %2410 = vmatprep.subr.mxu1 %v2600_v2 }
  0x46   : > { %2386 = vmatmul.mubr.msk.f32.vlgmr.msra.gmra.mxu0 %vm264_vm0, %v2721_v9  ;;  %2397 = vmatmul.mubr.msk.f32.vlgmr.msra.gmra.mxu1 %vm264_vm0, %v2721_v9 }
  0x47   : > { %2407 = vmatprep.mubr.msk.f32.mxu0 %vm2601_vm1, %v2600_v2  ;;  %2418 = vmatprep.mubr.msk.f32.mxu1 %vm2601_vm1, %v2600_v2 }
  0x48   : > { %2400 = vmatpush3.msra.mxu0 %v855_v42  ;;  %2411 = vmatpush3.msra.mxu1 %v859_v43 }
  0x49   : > { %2401 = vmatprep.subr.mxu0 %v2600_v2  ;;  %2412 = vmatprep.subr.mxu1 %v2600_v2 }
  0x4a   : > { %2402 = vmatpush3.msra.mxu0 %v854_v44  ;;  %2413 = vmatpush3.msra.mxu1 %v858_v45 }
  0x4b   : > { %2403 = vmatprep.subr.mxu0 %v2600_v2  ;;  %2414 = vmatprep.subr.mxu1 %v2600_v2 }
  0x4c   : > { %2404 = vmatpush3.msra.mxu0 %v853_v46  ;;  %2415 = vmatpush3.msra.mxu1 %v857_v47 }
  0x4d   : > { %2405 = vmatprep.subr.mxu0 %v2600_v2  ;;  %2416 = vmatprep.subr.mxu1 %v2600_v2 }
  0x4e   : > { %2406 = vmatpush3.msra.mxu0 %v852_v48  ;;  %2417 = vmatpush3.msra.mxu1 %v856_v49 }
  0x4f   : > { %2408 = vmatmul.mubr.msk.f32.vlgmr.msra.gmra.mxu0 %vm264_vm0, %v2721_v9  ;;  %2419 = vmatmul.mubr.msk.f32.vlgmr.msra.gmra.mxu1 %vm264_vm0, %v2721_v9 }
  0x50   : > { %2421 = vmatprep.subr.mxu0 %v2600_v2  ;;  %2426 = vmatprep.subr.mxu1 %v2600_v2 }
  0x51   : > { %2423 = vmatprep.mubr.msk.f32.mxu0 %vm2601_vm1, %v2600_v2  ;;  %2428 = vmatprep.mubr.msk.f32.mxu1 %vm2601_vm1, %v2600_v2 }
  0xdc   : > { %v334_v50 = vpop.f32.mrf.mxu0 }
  0xde   : > { %v2299_v51 = vpop.f32.mrf.mxu0  ;;  %v404_v52 = vpop.f32.mrf.mxu1 }
  0xe0   : > { %v2310_v53 = vpop.f32.mrf.mxu1 }
  0xe6   : > { %v474_v54 = vpop.f32.mrf.mxu0 }
  0xe8   : > { %v2321_v55 = vpop.f32.mrf.mxu0  ;;  %v544_v56 = vpop.f32.mrf.mxu1 }
  0xe9   : > { %v1781_v55 = vld [vmem:[%s3054_s4] sm:$0xff] }
  0xea   : > { %v2332_v57 = vpop.f32.mrf.mxu1 }
  0xeb   : > { %v1783_v57 = vld [vmem:[%s3054_s4 + $0x10] sm:$0xff] }
  0xf1   : > { %v630_v58 = vpop.f32.mrf.mxu0  ;;  %v700_v59 = vpop.f32.mrf.mxu1 }
  0xf2   : > { %2422 = vmatpush3.xpose.msk.msra.mxu0 %vm1140_vm2, %v630_v58  ;;  %2427 = vmatpush3.xpose.msk.msra.mxu1 %vm1140_vm2, %v700_v59 }
  0xf3   : > { %v2343_v60 = vpop.f32.mrf.mxu0  ;;  %v2354_v61 = vpop.f32.mrf.mxu1  ;;  %2431 = vmatprep.subr.mxu0 %v2600_v2  ;;  %2436 = vmatprep.subr.mxu1 %v2600_v2 }
  0xf4   : > { %v1784_v60 = vld [vmem:[%s3054_s4 + $0x18] sm:$0xff] }
  0xf5   : > { %2424 = vmatmul.mubr.msk.f32.vlgmr.msra.gmra.mxu0 %vm1140_vm2, %v334_v50  ;;  %2429 = vmatmul.mubr.msk.f32.vlgmr.msra.gmra.mxu1 %vm1140_vm2, %v404_v52 }
  0xf6   : > { %2433 = vmatprep.mubr.msk.f32.mxu0 %vm2601_vm1, %v2600_v2  ;;  %2438 = vmatprep.mubr.msk.f32.mxu1 %vm2601_vm1, %v2600_v2 }
  0xfb   : > { %v770_v62 = vpop.f32.mrf.mxu0  ;;  %v840_v63 = vpop.f32.mrf.mxu1 }
  0xfc   : > { %2432 = vmatpush3.xpose.msk.msra.mxu0 %vm1140_vm2, %v770_v62  ;;  %2437 = vmatpush3.xpose.msk.msra.mxu1 %vm1140_vm2, %v840_v63 }
  0xfd   : > { %v2365_v0 = vpop.f32.mrf.mxu0  ;;  %v2376_v1 = vpop.f32.mrf.mxu1  ;;  %2441 = vmatprep.subr.mxu0 %v2600_v2  ;;  %2446 = vmatprep.subr.mxu1 %v2600_v2 }
  0xff   : > { %2434 = vmatmul.mubr.msk.f32.vlgmr.msra.gmra.mxu0 %vm1140_vm2, %v474_v54  ;;  %2439 = vmatmul.mubr.msk.f32.vlgmr.msra.gmra.mxu1 %vm1140_vm2, %v544_v56  ;;  %v1782_v56 = vld [vmem:[%s3054_s4 + $0x8] sm:$0xff] }
 0x100   : > { %2443 = vmatprep.mubr.msk.f32.mxu0 %vm2601_vm1, %v2600_v2  ;;  %2448 = vmatprep.mubr.msk.f32.mxu1 %vm2601_vm1, %v2600_v2 }
 0x106   : > { %v926_v3 = vpop.f32.mrf.mxu0  ;;  %v996_v4 = vpop.f32.mrf.mxu1 }
 0x107   : > { %2442 = vmatpush3.msra.mxu0 %v926_v3  ;;  %2447 = vmatpush3.msra.mxu1 %v996_v4 }
 0x108   : > { %v2387_v5 = vpop.f32.mrf.mxu0  ;;  %v2398_v6 = vpop.f32.mrf.mxu1  ;;  %2451 = vmatprep.subr.mxu0 %v2600_v2  ;;  %2456 = vmatprep.subr.mxu1 %v2600_v2 }
 0x10f   : > { %v1066_v7 = vpop.f32.mrf.mxu0  ;;  %v2961_v8 = vpop.f32.mrf.mxu1 }
 0x111   : > { %v2409_v9 = vpop.f32.mrf.mxu0  ;;  %v2420_v10 = vpop.f32.mrf.mxu1 }
 0x1b5   : > { %v1213_v11 = vpop.f32.mrf.mxu0  ;;  %v1289_v12 = vpop.f32.mrf.mxu1 }
 0x1b6   : > { %v1445_v13 = vsel %vm1140_vm2, %v1213_v11, -inf  ;;  %v1448_v16 = vsel %vm1140_vm2, %v1289_v12, -inf }
 0x1b7   : > { %v2430_v14 = vpop.f32.mrf.mxu1  ;;  %1446 = vmax.xlane.f32.xlu0 %v1445_v13  ;;  %v2425_v15 = vpop.f32.mrf.mxu0 }
 0x1bb   : > { %1449 = vmax.xlane.f32.xlu0 %v1448_v16  ;;  %v2200_v16 = vld [vmem:[%s3055_s5] ss:$0 sm:$0xff] }
 0x1bf   : > { %v1365_v17 = vpop.f32.mrf.mxu0  ;;  %v1441_v18 = vpop.f32.mrf.mxu1 }
 0x1c0   : > { %v1451_v19 = vsel %vm1140_vm2, %v1365_v17, -inf  ;;  %v1454_v22 = vsel %vm1140_vm2, %v1441_v18, -inf }
 0x1c1   : > { %v2440_v20 = vpop.f32.mrf.mxu1  ;;  %1452 = vmax.xlane.f32.xlu1 %v1451_v19  ;;  %v2435_v21 = vpop.f32.mrf.mxu0 }
 0x1c5   : > { %1455 = vmax.xlane.f32.xlu1 %v1454_v22 }
 0x240   : > { %v1447_v23 = vpop.xlane.xlu0 %1446 }
 0x241   : > { %v1457_v24 = vsub.f32 %v1213_v11, %v1447_v23 }
 0x243   : > { %v1461_v25 = vmul.f32 1.442695, %v1457_v24 }
 0x244   : > { %v1450_v26 = vpop.xlane.xlu0 %1449 }
 0x245   : > { %2522 = vpow2.f32 %v1461_v25  ;;  %v1458_v27 = vsub.f32 %v1289_v12, %v1450_v26 }
 0x247   : > { %v1463_v28 = vmul.f32 1.442695, %v1458_v27 }
 0x249   : > { %2524 = vpow2.f32 %v1463_v28 }
 0x24a   : > { %v1453_v29 = vpop.xlane.xlu1 %1452 }
 0x24b   : > { %v1459_v30 = vsub.f32 %v1365_v17, %v1453_v29 }
 0x24d   : > { %v1465_v31 = vmul.f32 1.442695, %v1459_v30 }
 0x24e   : > { %v1456_v32 = vpop.xlane.xlu1 %1455 }
 0x24f   : > { %2526 = vpow2.f32 %v1465_v31  ;;  %v1460_v33 = vsub.f32 %v1441_v18, %v1456_v32 }
 0x251   : > { %v1467_v34 = vmul.f32 1.442695, %v1460_v33 }
 0x252   : > { %v2523_v35 = vpop.eup %2522 }
 0x253   : > { %2528 = vpow2.f32 %v1467_v34  ;;  %v1469_v36 = vsel %vm1140_vm2, %v2523_v35, 0.0 }
 0x254   : > { %1470 = vadd.xlane.f32.xlu0 %v1469_v36 }
 0x256   : > { %v2525_v37 = vpop.eup %2524 }
 0x257   : > { %v1472_v38 = vsel %vm1140_vm2, %v2525_v37, 0.0 }
 0x258   : > { %1473 = vadd.xlane.f32.xlu1 %v1472_v38 }
 0x25c   : > { %v2527_v39 = vpop.eup %2526 }
 0x25d   : > { %v1475_v40 = vsel %vm1140_vm2, %v2527_v39, 0.0 }
 0x25e   : > { %1476 = vadd.xlane.f32.xlu0 %v1475_v40 }
 0x260   : > { %v2529_v41 = vpop.eup %2528 }
 0x261   : > { %v1478_v42 = vsel %vm1140_vm2, %v2529_v41, 0.0 }
 0x262   : > { %1479 = vadd.xlane.f32.xlu1 %v1478_v42 }
 0x2dd   : > { %v1471_v43 = vpop.xlane.xlu0 %1470 }
 0x2de   : > { %2530 = vrcp.f32 %v1471_v43 }
 0x2e1   : > { %v1474_v44 = vpop.xlane.xlu1 %1473 }
 0x2e2   : > { %2532 = vrcp.f32 %v1474_v44 }
 0x2e7   : > { %v1477_v45 = vpop.xlane.xlu0 %1476 }
 0x2e8   : > { %2534 = vrcp.f32 %v1477_v45 }
 0x2eb   : > { %v2531_v46 = vpop.eup %2530  ;;  %v1480_v47 = vpop.xlane.xlu1 %1479 }
 0x2ec   : > { %2536 = vrcp.f32 %v1480_v47  ;;  %v1482_v48 = vmul.f32 %v2531_v46, %v2523_v35 }
 0x2ee   : > { %2444 = vmatmul.mubr.msk.f32.vlgmr.msra.gmra.mxu0 %vm1140_vm2, %v1482_v48 }
 0x2ef   : > { %v2533_v49 = vpop.eup %2532  ;;  %2452 = vmatpush3.msra.mxu0 %v1066_v7  ;;  %2453 = vmatprep.mubr.msk.f32.mxu0 %vm2601_vm1, %v2600_v2 }
 0x2f0   : > { %v1484_v50 = vmul.f32 %v2533_v49, %v2525_v37  ;;  %2461 = vmatprep.subr.mxu0 %v2600_v2 }
 0x2f2   : > { %2449 = vmatmul.mubr.msk.f32.vlgmr.msra.gmra.mxu1 %vm1140_vm2, %v1484_v50 }
 0x2f3   : > { %2457 = vmatpush3.msra.mxu1 %v2961_v8  ;;  %2458 = vmatprep.mubr.msk.f32.mxu1 %vm2601_vm1, %v2600_v2 }
 0x2f4   : > { %2466 = vmatprep.subr.mxu1 %v2600_v2 }
 0x2f5   : > { %v2535_v51 = vpop.eup %2534 }
 0x2f6   : > { %v1486_v52 = vmul.f32 %v2535_v51, %v2527_v39 }
 0x2f8   : > { %2454 = vmatmul.mubr.msk.f32.vlgmr.msra.gmra.mxu0 %vm1140_vm2, %v1486_v52 }
 0x2f9   : > { %v2537_v53 = vpop.eup %2536  ;;  %2463 = vmatprep.mubr.msk.f32.mxu0 %vm2601_vm1, %v2600_v2  ;;  %2462 = vmatpush3.msra.mxu0 %v1781_v55 }
 0x2fa   : > { %v1488_v54 = vmul.f32 %v2537_v53, %v2529_v41  ;;  %2471 = vmatprep.subr.mxu0 %v2600_v2 }
 0x2fc   : > { %2459 = vmatmul.mubr.msk.f32.vlgmr.msra.gmra.mxu1 %vm1140_vm2, %v1488_v54 }
 0x2fd   : > { %2468 = vmatprep.mubr.msk.f32.mxu1 %vm2601_vm1, %v2600_v2  ;;  %2467 = vmatpush3.msra.mxu1 %v1782_v56 }
 0x2fe   : > { %2476 = vmatprep.subr.mxu1 %v2600_v2 }
 0x3ae   : > { %v1558_v58 = vpop.f32.mrf.mxu0 }
 0x3af   : > { %2464 = vmatmul.mubr.msk.f32.vlgmr.msra.gmra.mxu0 %vm1140_vm2, %v1558_v58 }
 0x3b0   : > { %v2445_v59 = vpop.f32.mrf.mxu0  ;;  %2472 = vmatpush3.msra.mxu0 %v1783_v57  ;;  %2473 = vmatprep.mubr.msk.f32.mxu0 %vm2601_vm1, %v2600_v2 }
 0x3b2   : > { %v1631_v61 = vpop.f32.mrf.mxu1 }
 0x3b3   : > { %2469 = vmatmul.mubr.msk.f32.vlgmr.msra.gmra.mxu1 %vm1140_vm2, %v1631_v61 }
 0x3b4   : > { %v2450_v62 = vpop.f32.mrf.mxu1  ;;  %2477 = vmatpush3.msra.mxu1 %v1784_v60  ;;  %2478 = vmatprep.mubr.msk.f32.mxu1 %vm2601_vm1, %v2600_v2 }
 0x3b8   : > { %v1704_v63 = vpop.f32.mrf.mxu0 }
 0x3b9   : > { %2474 = vmatmul.mubr.msk.f32.vlgmr.msra.gmra.mxu0 %vm1140_vm2, %v1704_v63 }
 0x3ba   : > { %v2455_v0 = vpop.f32.mrf.mxu0 }
 0x3bc   : > { %v1777_v1 = vpop.f32.mrf.mxu1 }
 0x3bd   : > { %2479 = vmatmul.mubr.msk.f32.vlgmr.msra.gmra.mxu1 %vm1140_vm2, %v1777_v1 }
 0x3be   : > { %v2460_v3 = vpop.f32.mrf.mxu1 }
 0x46f   : > { %v1854_v4 = vpop.f32.mrf.mxu0 }
 0x470   : > { %v2077_v2 = vsel %vm264_vm0, %v1854_v4, 0.0 }
 0x471   : > { %v2465_v5 = vpop.f32.mrf.mxu0 }
 0x473   : > { %v1927_v6 = vpop.f32.mrf.mxu1 }
 0x474   : > { %v2078_v8 = vsel %vm264_vm0, %v1927_v6, 0.0 }
 0x475   : > { %v2470_v7 = vpop.f32.mrf.mxu1  ;;  %v2079_v11 = vadd.f32 %v2078_v8, %v2077_v2 }
 0x479   : > { %v2000_v9 = vpop.f32.mrf.mxu0 }
 0x47a   : > { %v2080_v10 = vsel %vm264_vm0, %v2000_v9, 0.0 }
 0x47b   : > { %v2475_v12 = vpop.f32.mrf.mxu0  ;;  %v2081_v13 = vadd.f32 %v2080_v10, %v2079_v11 }
 0x47d   : > { %v2073_v14 = vpop.f32.mrf.mxu1 }
 0x47e   : > { %v2082_v15 = vsel %vm264_vm0, %v2073_v14, 0.0 }
 0x47f   : > { %v2083_v17 = vadd.f32 %v2082_v15, %v2081_v13  ;;  %v2480_v18 = vpop.f32.mrf.mxu1 }
 0x481   : > { %v2091_v19 = vadd.f32 %v2200_v16, %v2083_v17 }
 0x483   : > { %2092 = vst.msk [vmem:[%s242_s18] sm:$0xff] %vm264_vm0, %v2091_v19 }
 0x484   : > { %2551 = shalt.err (!%p2548_p3)
}
 0x485   : > { %s2552_s12 = scalar_lea.hbm %s2105_s28, 128  ;;  %s2556_s15 = scalar_lea.hbm %s3056_s6, 256 }
 0x486   : > { %p2553_p4 = scmp.ne.s32.totalorder %s2105_s28, %s2552_s12  ;;  %p2557_p9 = scmp.lt.s32.totalorder %s2105_s28, %s3056_s6 }
 0x487   : > { %p2558_p10 = scmp.lt.s32.totalorder %s2556_s15, %s2552_s12 }
 0x488   : > { %p2554_p7 = pnand %p2553_p4, %p2676_p5 }
 0x489   : > { %p2559_p11 = por %p2558_p10, %p2557_p9 }
 0x48a   : > { %p2555_p8 = pneg %p2554_p7 }
 0x48c   : > { %p2560_p12 = pnand %p2559_p11, %p2555_p8 }
 0x48e   : > { %2563 = shalt.err (!%p2560_p12)
}
 0x48f   : > { %2481 = dma.vmem_to_hbm [thread:$0]  (%p2676_p5), %s2108_s19, 128, %s2105_s28, %s2094_s29  }
 0x490 PF: > { %p2487_p13 = scmp.ge.s32.totalorder %s2598_s24, 2  ;;  %s2119_s18 = sand.u32 1, %s2586_s21  }
 0x491   : > { %s2120_s20 = scalar_lea.sflag [#allocation3], %s2119_s18 }
 0x492   : > { %p2484_p0 = pnand %p2487_p13, %p2680_p6 }
 0x494   : > { %p2485_p1 = pneg %p2484_p0 }
 0x496   : > { %2581 = dma.done.wait (%p2485_p1), %s2120_s20, 128  }
 0x497   : > { %2583 = vsyncadd (%p2485_p1), %s2120_s20, 4294967168  ;;  %p16_p2 = scmp.ge.s32.totalorder %s2663_s27, 4   ;;  %s3059_s21 = smov %s2590_s22 }
 0x498   : > { %s3060_s22 = smov %s2594_s23  ;;  %s3061_s23 = smov %s2674_s30 }
 0x499   : > { %s3062_s24 = smov %s2663_s27  ;;  %18 = sbr.rel (!%p16_p2) target bundleno = 3 (0x3), region = 79 }
 0x49e   :  { %2125 = vsyncpa [#allocation3], 1 }
 0x49f   :  { %2127 = vsyncpa [#allocation3 + $0x1], 1 }

</bundles_post_ra>
